<compile_context>
chip_gen: v7x
topology: tpu7x:2x2x1
jax: 0.10.0
libtpu: 0.0.40
codegen_flags: <defaults>
</compile_context>

<pallas_src>
import jax
import jax.numpy as jnp
from jax import lax
from jax.experimental import pallas as pl
from jax.experimental.pallas import tpu as pltpu

EPS = 1e-12       # F.normalize default eps
HIDDEN = 64


def _l2_normalize(v):
    # v / max(||v||_2, eps)  ==  v * rsqrt(max(sum(v*v), eps^2))   (EUP rsqrt)
    ss = jnp.sum(v * v, axis=-1, keepdims=True)
    return v * lax.rsqrt(jnp.maximum(ss, EPS * EPS))


def _make_kernel(n_children):
    """Kernel with one input per child message and per-child fc2 weight slices."""

    def kernel(*refs):
        x_ref = refs[0]
        m_refs = refs[1:1 + n_children]
        i = 1 + n_children
        w1_ref, b1_ref, w2h_ref = refs[i], refs[i + 1], refs[i + 2]
        w2c_refs = refs[i + 3:i + 3 + n_children]
        b2_ref = refs[i + 3 + n_children]
        w3_ref = refs[i + 4 + n_children]
        b3_ref = refs[i + 5 + n_children]
        out_ref = refs[i + 6 + n_children]

        # fc1 + L2 normalize
        h = jnp.dot(x_ref[...], w1_ref[...],
                    preferred_element_type=jnp.float32) + b1_ref[...]
        h = _l2_normalize(h)                                   # (TILE_B, 64)

        # tanh(cat([h, m0, m1, ...])) @ w2
        #   == tanh(h) @ w2[:64] + sum_i tanh(m_i) @ w2[64+i*msg : 64+(i+1)*msg]
        h2 = jnp.dot(jnp.tanh(h), w2h_ref[...],
                     preferred_element_type=jnp.float32)
        for m_ref, w2c_ref in zip(m_refs, w2c_refs):
            h2 = h2 + jnp.dot(jnp.tanh(m_ref[...]), w2c_ref[...],
                              preferred_element_type=jnp.float32)
        h2 = jnp.tanh(h2 + b2_ref[...])                        # (TILE_B, 64)

        # fc3 + L2 normalize  (true msg_dim width — no lane padding)
        h3 = jnp.dot(h2, w3_ref[...],
                     preferred_element_type=jnp.float32) + b3_ref[...]
        out_ref[...] = _l2_normalize(h3).astype(out_ref.dtype)

    return kernel


def _choose_tile_b(B):
    """Balanced batch tiles: large (amortize ~0.35 us/step), multiple of 8,
    >= 2 steps once B is big enough so both v7x TensorCores get work."""
    if B <= 256:
        return B                              # single step; tiny problem
    cap = 1024
    n_steps = max(2, pl.cdiv(B, cap))
    tile = ((pl.cdiv(B, n_steps) + 7) // 8) * 8
    return min(tile, cap)


def actor_up_forward(x, msgs, params):
    """x: (B, state_dim); msgs: list of (B, msg_dim) arrays (len = max_children)."""
    w1, b1, w2, b2, w3, b3 = params
    n_children = len(msgs)

    B, state_dim = x.shape
    msg_dim = w3.shape[1]

    # Split fc2 weight: h-part plus one slice per child message (no concat).
    w2_h = w2[:HIDDEN]                                          # (64, 64)
    w2_children = [
        w2[HIDDEN + i * msg_dim: HIDDEN + (i + 1) * msg_dim]    # (msg_dim, 64)
        for i in range(n_children)
    ]

    TILE_B = _choose_tile_b(B)
    grid = (pl.cdiv(B, TILE_B),)

    def row_spec(feat):
        return pl.BlockSpec((TILE_B, feat), lambda i: (i, 0))

    def full_spec(a):
        return pl.BlockSpec(a.shape, lambda i: (0, 0))          # resident weights

    in_specs = (
        [row_spec(state_dim)]
        + [row_spec(msg_dim) for _ in range(n_children)]
        + [full_spec(w1), full_spec(b1), full_spec(w2_h)]
        + [full_spec(wc) for wc in w2_children]
        + [full_spec(b2), full_spec(w3), full_spec(b3)]
    )

    # VMEM budget derived from the actual footprint (double-buffered tiles +
    # weights + headroom), clamped to v7x's 64 MiB physical VMEM.
    tile_bytes = 4 * TILE_B * (state_dim + n_children * msg_dim + msg_dim)
    weight_bytes = 4 * (w1.size + b1.size + w2.size + b2.size + w3.size + b3.size)
    vmem_limit = min(max(2 * tile_bytes + 2 * weight_bytes + (4 << 20), 16 << 20),
                     64 << 20)

    msg_in = n_children * msg_dim
    flops = 2 * B * (state_dim * HIDDEN + HIDDEN * HIDDEN
                     + msg_in * HIDDEN + HIDDEN * msg_dim)
    transcendentals = B * (HIDDEN + msg_in + 2)                 # tanh + 2 rsqrt / row
    bytes_accessed = 4 * (x.size + B * msg_in + w1.size + b1.size + w2.size
                          + b2.size + w3.size + b3.size + B * msg_dim)

    out = pl.pallas_call(
        _make_kernel(n_children),
        out_shape=jax.ShapeDtypeStruct((B, msg_dim), jnp.float32),
        grid=grid,
        in_specs=in_specs,
        out_specs=row_spec(msg_dim),
        compiler_params=pltpu.CompilerParams(
            dimension_semantics=("parallel",),                  # 2-TC sharding on v7x
            vmem_limit_bytes=int(vmem_limit),
        ),
        cost_estimate=pl.CostEstimate(
            flops=flops,
            transcendentals=transcendentals,
            bytes_accessed=bytes_accessed,
        ),
    )(x, *msgs, w1, b1, w2_h, *w2_children, b2, w3, b3)

    return out


def init_params(key, state_dim, msg_dim, max_children):
    """Deterministic synthetic parameters matching nn.Linear shapes."""
    k1, k2, k3, k4, k5, k6 = jax.random.split(key, 6)
    in2 = HIDDEN + msg_dim * max_children
    # stored as (in_features, out_features); biases kept 2-D (1, out) for TPU layout
    w1 = jax.random.normal(k1, (state_dim, HIDDEN), jnp.float32) * 0.1
    b1 = jax.random.normal(k2, (1, HIDDEN), jnp.float32) * 0.1
    w2 = jax.random.normal(k3, (in2, HIDDEN), jnp.float32) * 0.1
    b2 = jax.random.normal(k4, (1, HIDDEN), jnp.float32) * 0.1
    w3 = jax.random.normal(k5, (HIDDEN, msg_dim), jnp.float32) * 0.1
    b3 = jax.random.normal(k6, (1, msg_dim), jnp.float32) * 0.1
    return (w1, b1, w2, b2, w3, b3)


def reference_forward(x, msgs, params):
    """Pure-JAX reference mirroring the PyTorch module exactly."""
    w1, b1, w2, b2, w3, b3 = params
    m = jnp.concatenate(msgs, axis=-1)
    h = x @ w1 + b1
    h = h / jnp.maximum(jnp.linalg.norm(h, axis=-1, keepdims=True), EPS)
    xm = jnp.tanh(jnp.concatenate([h, m], axis=-1))
    h2 = jnp.tanh(xm @ w2 + b2)
    h3 = h2 @ w3 + b3
    return h3 / jnp.maximum(jnp.linalg.norm(h3, axis=-1, keepdims=True), EPS)


if __name__ == "__main__":
    # Small shapes consistent with the module's forward signature.
    batch, state_dim, msg_dim, max_children = 8, 32, 16, 2

    key = jax.random.PRNGKey(0)
    kx, km1, km2, kp = jax.random.split(key, 4)

    x = jax.random.normal(kx, (batch, state_dim), jnp.float32)
    msgs = [jax.random.normal(km1, (batch, msg_dim), jnp.float32),
            jax.random.normal(km2, (batch, msg_dim), jnp.float32)]
    params = init_params(kp, state_dim, msg_dim, max_children)

    out = actor_up_forward(x, msgs, params)
    jax.block_until_ready(out)

    ref = reference_forward(x, msgs, params)
    assert out.shape == (batch, msg_dim)
    assert jnp.allclose(out, ref, atol=2e-5, rtol=2e-5), "mismatch vs reference"

    print("KERNEL_OK")
</pallas_src>

<mosaic_0001>
module attributes {stable_mosaic.version = 11 : i64} {
  func.func @kernel(%arg0: i32, %arg1: memref<8x32xf32, #tpu.memory_space<vmem>>, %arg2: memref<8x16xf32, #tpu.memory_space<vmem>>, %arg3: memref<8x16xf32, #tpu.memory_space<vmem>>, %arg4: memref<32x64xf32, #tpu.memory_space<vmem>>, %arg5: memref<1x64xf32, #tpu.memory_space<vmem>>, %arg6: memref<64x64xf32, #tpu.memory_space<vmem>>, %arg7: memref<16x64xf32, #tpu.memory_space<vmem>>, %arg8: memref<16x64xf32, #tpu.memory_space<vmem>>, %arg9: memref<1x64xf32, #tpu.memory_space<vmem>>, %arg10: memref<64x16xf32, #tpu.memory_space<vmem>>, %arg11: memref<1x16xf32, #tpu.memory_space<vmem>>, %arg12: memref<8x16xf32, #tpu.memory_space<vmem>>) attributes {dimension_semantics = [#tpu.dimension_semantics<parallel>], iteration_bounds = array<i64: 1>, scalar_prefetch = 0 : i64, scratch_operands = 0 : i64, tpu.core_type = #tpu.core_type<tc>, window_params = [{transform_indices = @transform_0, window_bounds = array<i64: 8, 32>}, {transform_indices = @transform_1, window_bounds = array<i64: 8, 16>}, {transform_indices = @transform_2, window_bounds = array<i64: 8, 16>}, {pipeline_mode = #tpu.pipeline_mode<synchronous>, transform_indices = @transform_3, window_bounds = array<i64: 32, 64>}, {pipeline_mode = #tpu.pipeline_mode<synchronous>, transform_indices = @transform_4, window_bounds = array<i64: 1, 64>}, {pipeline_mode = #tpu.pipeline_mode<synchronous>, transform_indices = @transform_5, window_bounds = array<i64: 64, 64>}, {pipeline_mode = #tpu.pipeline_mode<synchronous>, transform_indices = @transform_6, window_bounds = array<i64: 16, 64>}, {pipeline_mode = #tpu.pipeline_mode<synchronous>, transform_indices = @transform_7, window_bounds = array<i64: 16, 64>}, {pipeline_mode = #tpu.pipeline_mode<synchronous>, transform_indices = @transform_8, window_bounds = array<i64: 1, 64>}, {pipeline_mode = #tpu.pipeline_mode<synchronous>, transform_indices = @transform_9, window_bounds = array<i64: 64, 16>}, {pipeline_mode = #tpu.pipeline_mode<synchronous>, transform_indices = @transform_10, window_bounds = array<i64: 1, 16>}, {transform_indices = @transform_11, window_bounds = array<i64: 8, 16>}]} {
    %c0 = arith.constant 0 : index
    %c0_0 = arith.constant 0 : index
    %0 = vector.load %arg1[%c0, %c0_0] : memref<8x32xf32, #tpu.memory_space<vmem>>, vector<8x32xf32>
    %c0_1 = arith.constant 0 : index
    %c0_2 = arith.constant 0 : index
    %1 = vector.load %arg4[%c0_1, %c0_2] : memref<32x64xf32, #tpu.memory_space<vmem>>, vector<32x64xf32>
    %cst = arith.constant dense<0.000000e+00> : vector<8x64xf32>
    %2 = tpu.matmul %0, %1, %cst {dimension_numbers = #tpu.dot_dimension_numbers<[1], [0], [0], [1], [0, 0, 1, 1], [], []>} : vector<8x32xf32>, vector<32x64xf32>, vector<8x64xf32> -> vector<8x64xf32>
    %c0_3 = arith.constant 0 : index
    %c0_4 = arith.constant 0 : index
    %3 = vector.load %arg5[%c0_3, %c0_4] : memref<1x64xf32, #tpu.memory_space<vmem>>, vector<1x64xf32>
    %4 = vector.broadcast %3 : vector<1x64xf32> to vector<8x64xf32>
    %5 = arith.addf %2, %4 : vector<8x64xf32>
    %6 = arith.mulf %5, %5 : vector<8x64xf32>
    %cst_5 = arith.constant dense<0.000000e+00> : vector<8xf32>
    %7 = vector.multi_reduction <add>, %6, %cst_5 [1] : vector<8x64xf32> to vector<8xf32>
    %8 = vector.shape_cast %7 : vector<8xf32> to vector<8x1xf32>
    %cst_6 = arith.constant 1.000000e-24 : f32
    %9 = vector.broadcast %cst_6 : f32 to vector<8x1xf32>
    %10 = arith.maximumf %8, %9 : vector<8x1xf32>
    %11 = math.rsqrt %10 : vector<8x1xf32>
    %12 = vector.broadcast %11 : vector<8x1xf32> to vector<8x64xf32>
    %13 = arith.mulf %5, %12 : vector<8x64xf32>
    %14 = math.tanh %13 : vector<8x64xf32>
    %c0_7 = arith.constant 0 : index
    %c0_8 = arith.constant 0 : index
    %15 = vector.load %arg6[%c0_7, %c0_8] : memref<64x64xf32, #tpu.memory_space<vmem>>, vector<64x64xf32>
    %cst_9 = arith.constant dense<0.000000e+00> : vector<8x64xf32>
    %16 = tpu.matmul %14, %15, %cst_9 {dimension_numbers = #tpu.dot_dimension_numbers<[1], [0], [0], [1], [0, 0, 1, 1], [], []>} : vector<8x64xf32>, vector<64x64xf32>, vector<8x64xf32> -> vector<8x64xf32>
    %c0_10 = arith.constant 0 : index
    %c0_11 = arith.constant 0 : index
    %17 = vector.load %arg2[%c0_10, %c0_11] : memref<8x16xf32, #tpu.memory_space<vmem>>, vector<8x16xf32>
    %18 = math.tanh %17 : vector<8x16xf32>
    %c0_12 = arith.constant 0 : index
    %c0_13 = arith.constant 0 : index
    %19 = vector.load %arg7[%c0_12, %c0_13] : memref<16x64xf32, #tpu.memory_space<vmem>>, vector<16x64xf32>
    %cst_14 = arith.constant dense<0.000000e+00> : vector<8x64xf32>
    %20 = tpu.matmul %18, %19, %cst_14 {dimension_numbers = #tpu.dot_dimension_numbers<[1], [0], [0], [1], [0, 0, 1, 1], [], []>} : vector<8x16xf32>, vector<16x64xf32>, vector<8x64xf32> -> vector<8x64xf32>
    %21 = arith.addf %16, %20 : vector<8x64xf32>
    %c0_15 = arith.constant 0 : index
    %c0_16 = arith.constant 0 : index
    %22 = vector.load %arg3[%c0_15, %c0_16] : memref<8x16xf32, #tpu.memory_space<vmem>>, vector<8x16xf32>
    %23 = math.tanh %22 : vector<8x16xf32>
    %c0_17 = arith.constant 0 : index
    %c0_18 = arith.constant 0 : index
    %24 = vector.load %arg8[%c0_17, %c0_18] : memref<16x64xf32, #tpu.memory_space<vmem>>, vector<16x64xf32>
    %cst_19 = arith.constant dense<0.000000e+00> : vector<8x64xf32>
    %25 = tpu.matmul %23, %24, %cst_19 {dimension_numbers = #tpu.dot_dimension_numbers<[1], [0], [0], [1], [0, 0, 1, 1], [], []>} : vector<8x16xf32>, vector<16x64xf32>, vector<8x64xf32> -> vector<8x64xf32>
    %26 = arith.addf %21, %25 : vector<8x64xf32>
    %c0_20 = arith.constant 0 : index
    %c0_21 = arith.constant 0 : index
    %27 = vector.load %arg9[%c0_20, %c0_21] : memref<1x64xf32, #tpu.memory_space<vmem>>, vector<1x64xf32>
    %28 = vector.broadcast %27 : vector<1x64xf32> to vector<8x64xf32>
    %29 = arith.addf %26, %28 : vector<8x64xf32>
    %30 = math.tanh %29 : vector<8x64xf32>
    %c0_22 = arith.constant 0 : index
    %c0_23 = arith.constant 0 : index
    %31 = vector.load %arg10[%c0_22, %c0_23] : memref<64x16xf32, #tpu.memory_space<vmem>>, vector<64x16xf32>
    %cst_24 = arith.constant dense<0.000000e+00> : vector<8x16xf32>
    %32 = tpu.matmul %30, %31, %cst_24 {dimension_numbers = #tpu.dot_dimension_numbers<[1], [0], [0], [1], [0, 0, 1, 1], [], []>} : vector<8x64xf32>, vector<64x16xf32>, vector<8x16xf32> -> vector<8x16xf32>
    %c0_25 = arith.constant 0 : index
    %c0_26 = arith.constant 0 : index
    %33 = vector.load %arg11[%c0_25, %c0_26] : memref<1x16xf32, #tpu.memory_space<vmem>>, vector<1x16xf32>
    %34 = vector.broadcast %33 : vector<1x16xf32> to vector<8x16xf32>
    %35 = arith.addf %32, %34 : vector<8x16xf32>
    %36 = arith.mulf %35, %35 : vector<8x16xf32>
    %cst_27 = arith.constant dense<0.000000e+00> : vector<8xf32>
    %37 = vector.multi_reduction <add>, %36, %cst_27 [1] : vector<8x16xf32> to vector<8xf32>
    %38 = vector.shape_cast %37 : vector<8xf32> to vector<8x1xf32>
    %cst_28 = arith.constant 1.000000e-24 : f32
    %39 = vector.broadcast %cst_28 : f32 to vector<8x1xf32>
    %40 = arith.maximumf %38, %39 : vector<8x1xf32>
    %41 = math.rsqrt %40 : vector<8x1xf32>
    %42 = vector.broadcast %41 : vector<8x1xf32> to vector<8x16xf32>
    %43 = arith.mulf %35, %42 : vector<8x16xf32>
    %c0_29 = arith.constant 0 : index
    %c0_30 = arith.constant 0 : index
    %44 = vector.load %arg12[%c0_29, %c0_30] : memref<8x16xf32, #tpu.memory_space<vmem>>, vector<8x16xf32>
    tpu.vector_store %arg12[%c0_29, %c0_30], %43 {strides = array<i32>} : memref<8x16xf32, #tpu.memory_space<vmem>>, vector<8x16xf32>,
    return
  }
  func.func @transform_0(%arg0: i32) -> (i32, i32) {
    %c0_i32 = arith.constant 0 : i32
    %c0_i32_0 = arith.constant 0 : i32
    return %arg0, %c0_i32 : i32, i32
  }
  func.func @transform_1(%arg0: i32) -> (i32, i32) {
    %c0_i32 = arith.constant 0 : i32
    %c0_i32_0 = arith.constant 0 : i32
    return %arg0, %c0_i32 : i32, i32
  }
  func.func @transform_2(%arg0: i32) -> (i32, i32) {
    %c0_i32 = arith.constant 0 : i32
    %c0_i32_0 = arith.constant 0 : i32
    return %arg0, %c0_i32 : i32, i32
  }
  func.func @transform_3(%arg0: i32) -> (i32, i32) {
    %c0_i32 = arith.constant 0 : i32
    %c0_i32_0 = arith.constant 0 : i32
    %c0_i32_1 = arith.constant 0 : i32
    return %c0_i32, %c0_i32_0 : i32, i32
  }
  func.func @transform_4(%arg0: i32) -> (i32, i32) {
    %c0_i32 = arith.constant 0 : i32
    %c0_i32_0 = arith.constant 0 : i32
    %c0_i32_1 = arith.constant 0 : i32
    return %c0_i32, %c0_i32_0 : i32, i32
  }
  func.func @transform_5(%arg0: i32) -> (i32, i32) {
    %c0_i32 = arith.constant 0 : i32
    %c0_i32_0 = arith.constant 0 : i32
    %c0_i32_1 = arith.constant 0 : i32
    return %c0_i32, %c0_i32_0 : i32, i32
  }
  func.func @transform_6(%arg0: i32) -> (i32, i32) {
    %c0_i32 = arith.constant 0 : i32
    %c0_i32_0 = arith.constant 0 : i32
    %c0_i32_1 = arith.constant 0 : i32
    return %c0_i32, %c0_i32_0 : i32, i32
  }
  func.func @transform_7(%arg0: i32) -> (i32, i32) {
    %c0_i32 = arith.constant 0 : i32
    %c0_i32_0 = arith.constant 0 : i32
    %c0_i32_1 = arith.constant 0 : i32
    return %c0_i32, %c0_i32_0 : i32, i32
  }
  func.func @transform_8(%arg0: i32) -> (i32, i32) {
    %c0_i32 = arith.constant 0 : i32
    %c0_i32_0 = arith.constant 0 : i32
    %c0_i32_1 = arith.constant 0 : i32
    return %c0_i32, %c0_i32_0 : i32, i32
  }
  func.func @transform_9(%arg0: i32) -> (i32, i32) {
    %c0_i32 = arith.constant 0 : i32
    %c0_i32_0 = arith.constant 0 : i32
    %c0_i32_1 = arith.constant 0 : i32
    return %c0_i32, %c0_i32_0 : i32, i32
  }
  func.func @transform_10(%arg0: i32) -> (i32, i32) {
    %c0_i32 = arith.constant 0 : i32
    %c0_i32_0 = arith.constant 0 : i32
    %c0_i32_1 = arith.constant 0 : i32
    return %c0_i32, %c0_i32_0 : i32, i32
  }
  func.func @transform_11(%arg0: i32) -> (i32, i32) {
    %c0_i32 = arith.constant 0 : i32
    %c0_i32_0 = arith.constant 0 : i32
    return %arg0, %c0_i32 : i32, i32
  }
}

</mosaic_0001>

<bundles_post_ra>
// kernel: tpu_custom_call.1
= control target key start
LH: loop header
LB: loop body
LE: loop exit
PB: predicated region body
PF: predicated region fallthrough
CT: control target
= control target key end

     0   :  { %16 = vsyncpa [#allocation3], 0  ;;  %s1108_s0 = inlined_call_operand.hbm [shape: f32[8,32], index: 0, kind: input, shape index: {}]   ;;  %s1109_s1 = inlined_call_operand.hbm [shape: f32[8,16], index: 1, kind: input, shape index: {}]   ;;  %s1110_s2 = inlined_call_operand.hbm [shape: f32[8,16], index: 2, kind: input, shape index: {}]   ;;  %s1111_s3 = inlined_call_operand.vmem [shape: f32[32,64], index: 3, kind: input, shape index: {}]   ;;  %s1112_s4 = inlined_call_operand.vmem [shape: f32[1,64], index: 4, kind: input, shape index: {}]   ;;  %s1113_s5 = inlined_call_operand.vmem [shape: f32[64,64], index: 5, kind: input, shape index: {}]   ;;  %s1114_s6 = inlined_call_operand.hbm [shape: f32[16,64], index: 6, kind: input, shape index: {}]   ;;  %s1115_s7 = inlined_call_operand.hbm [shape: f32[16,64], index: 7, kind: input, shape index: {}]   ;;  %s1116_s8 = inlined_call_operand.vmem [shape: f32[1,64], index: 8, kind: input, shape index: {}]   ;;  %s1117_s9 = inlined_call_operand.vmem [shape: f32[64,16], index: 9, kind: input, shape index: {}]   ;;  %s1118_s10 = inlined_call_operand.vmem [shape: f32[1,16], index: 10, kind: input, shape index: {}]   ;;  %s1119_s11 = inlined_call_operand.hbm [shape: f32[8,16], index: 11, kind: output, shape index: {}]  }
   0x1   :  { %17 = vsyncpa [#allocation6], 0 }
   0x2   :  { %18 = vsyncpa [#allocation9], 0 }
   0x3   :  { %19 = vsyncpa [#allocation4], 0  ;;  %s854_s17 = smov [#allocation5]   ;;  %s855_s19 = smov [#allocation8]  }
   0x4   :  { %s36_s18 = sshll.u32 %s854_s17, 4  ;;  %s61_s20 = sshll.u32 %s855_s19, 4  ;;  %s37_s18 = int_to_ptr.vmem [resolvable:$true] %s36_s18  ;;  %s925_s20 = int_to_ptr.vmem [resolvable:$true] %s61_s20 }
   0x5   :  { %s714_s23 = scalar_lea.hbm %s1109_s1, 128 }
   0x6   :  { %p715_p0 = scmp.ne.s32.totalorder %s1109_s1, %s714_s23  ;;  %p718_p1 = scmp.lt.u32.totalorder %s714_s23, %s1109_s1 }
   0x8   :  { %p720_p2 = pnand %p718_p1, %p715_p0 }
   0xa   :  { %723 = shalt.err (!%p720_p2)
}
   0xb   :  { %s724_s28 = scalar_lea.vmem %s37_s18, 128  ;;  %p729_p4 = scmp.lt.s32.totalorder %s37_s18, %s37_s18 }
   0xc   :  { %p725_p3 = scmp.ne.s32.totalorder %s37_s18, %s724_s28  ;;  %p730_p5 = scmp.lt.s32.totalorder %s724_s28, %s724_s28 }
   0xe   :  { %p731_p6 = por %p730_p5, %p729_p4 }
  0x10   :  { %p732_p7 = pnand %p731_p6, %p725_p3 }
  0x12   :  { %735 = shalt.err (!%p732_p7)
}
  0x13   :  { %39 = dma.hbm_to_vmem [thread:$0]  %s1109_s1, 128, %s37_s18, [#allocation6]  }
  0x14   :  { %s736_s14 = scalar_lea.hbm %s1114_s6, 256 }
  0x15   :  { %p737_p8 = scmp.ne.s32.totalorder %s1114_s6, %s736_s14  ;;  %p740_p9 = scmp.lt.u32.totalorder %s736_s14, %s1114_s6 }
  0x17   :  { %p742_p10 = pnand %p740_p9, %p737_p8 }
  0x19   :  { %745 = shalt.err (!%p742_p10)
}
  0x1a   :  { %s746_s21 = scalar_lea.vmem %s925_s20, 256  ;;  %p751_p12 = scmp.lt.s32.totalorder %s925_s20, %s925_s20 }
  0x1b   :  { %p747_p11 = scmp.ne.s32.totalorder %s925_s20, %s746_s21  ;;  %p752_p13 = scmp.lt.s32.totalorder %s746_s21, %s746_s21 }
  0x1d   :  { %p753_p0 = por %p752_p13, %p751_p12 }
  0x1f   :  { %p754_p1 = pnand %p753_p0, %p747_p11 }
  0x21   :  { %757 = shalt.err (!%p754_p1)
}
  0x22   :  { %s856_s1 = smov 128   ;;  %s857_s18 = smov 8  }
  0x23   :  { %67 = dma.hbm_to_vmem [thread:$0]  %s1114_s6, 256, %s925_s20, [#allocation9], %s856_s1, %s856_s1, %s857_s18  }
  0x24   :  { %s858_s24 = smov [#allocation2]   ;;  %s859_s26 = smov [#allocation7]  }
  0x25   :  { %s26_s25 = sshll.u32 %s858_s24, 4  ;;  %s46_s27 = sshll.u32 %s859_s26, 4  ;;  %s27_s25 = int_to_ptr.vmem [resolvable:$true] %s26_s25  ;;  %s47_s27 = int_to_ptr.vmem [resolvable:$true] %s46_s27 }
  0x26   :  { %s758_s30 = scalar_lea.hbm %s1108_s0, 128 }
  0x27   :  { %p759_p2 = scmp.ne.s32.totalorder %s1108_s0, %s758_s30  ;;  %p762_p3 = scmp.lt.u32.totalorder %s758_s30, %s1108_s0 }
  0x29   :  { %p764_p4 = pnand %p762_p3, %p759_p2 }
  0x2b   :  { %767 = shalt.err (!%p764_p4)
}
  0x2c   :  { %s768_s6 = scalar_lea.vmem %s27_s25, 128  ;;  %p773_p6 = scmp.lt.s32.totalorder %s27_s25, %s27_s25 }
  0x2d   :  { %p769_p5 = scmp.ne.s32.totalorder %s27_s25, %s768_s6  ;;  %p774_p7 = scmp.lt.s32.totalorder %s768_s6, %s768_s6 }
  0x2f   :  { %p775_p8 = por %p774_p7, %p773_p6 }
  0x31   :  { %p776_p9 = pnand %p775_p8, %p769_p5 }
  0x33   :  { %779 = shalt.err (!%p776_p9)
}
  0x34   :  { %29 = dma.hbm_to_vmem [thread:$0]  %s1108_s0, 128, %s27_s25, [#allocation3]  }
  0x35   :  { %s780_s21 = scalar_lea.hbm %s1110_s2, 128 }
  0x36   :  { %p781_p10 = scmp.ne.s32.totalorder %s1110_s2, %s780_s21  ;;  %p784_p11 = scmp.lt.u32.totalorder %s780_s21, %s1110_s2 }
  0x38   :  { %p786_p12 = pnand %p784_p11, %p781_p10 }
  0x3a   :  { %789 = shalt.err (!%p786_p12)
}
  0x3b   :  { %s790_s28 = scalar_lea.vmem %s47_s27, 128  ;;  %p795_p0 = scmp.lt.s32.totalorder %s47_s27, %s47_s27 }
  0x3c   :  { %p791_p13 = scmp.ne.s32.totalorder %s47_s27, %s790_s28  ;;  %p796_p1 = scmp.lt.s32.totalorder %s790_s28, %s790_s28 }
  0x3e   :  { %p797_p2 = por %p796_p1, %p795_p0 }
  0x40   :  { %p798_p3 = pnand %p797_p2, %p791_p13 }
  0x42   :  { %801 = shalt.err (!%p798_p3)
}
  0x43   :  { %49 = dma.hbm_to_vmem [thread:$0]  %s1110_s2, 128, %s47_s27, [#allocation6]  }
  0x44   :  { %s860_s29 = smov [#allocation10]   ;;  %s802_s14 = scalar_lea.hbm %s1115_s7, 256 }
  0x45   :  { %s73_s30 = sshll.u32 %s860_s29, 4  ;;  %p803_p4 = scmp.ne.s32.totalorder %s1115_s7, %s802_s14  ;;  %s74_s30 = int_to_ptr.vmem [resolvable:$true] %s73_s30 }
  0x46   :  { %p806_p5 = scmp.lt.u32.totalorder %s802_s14, %s1115_s7 }
  0x48   :  { %p808_p6 = pnand %p806_p5, %p803_p4 }
  0x4a   :  { %811 = shalt.err (!%p808_p6)
}
  0x4b   :  { %s812_s17 = scalar_lea.vmem %s74_s30, 256  ;;  %p817_p8 = scmp.lt.s32.totalorder %s74_s30, %s74_s30 }
  0x4c   :  { %p813_p7 = scmp.ne.s32.totalorder %s74_s30, %s812_s17  ;;  %p818_p9 = scmp.lt.s32.totalorder %s812_s17, %s812_s17 }
  0x4e   :  { %p819_p10 = por %p818_p9, %p817_p8 }
  0x50   :  { %p820_p11 = pnand %p819_p10, %p813_p7 }
  0x52   :  { %823 = shalt.err (!%p820_p11)
}
  0x53   :  { %79 = dma.hbm_to_vmem [thread:$0]  %s1115_s7, 256, %s74_s30, [#allocation9], %s856_s1, %s856_s1, %s857_s18  }
  0x54   :  { %846 = dma.done.wait [#allocation3], 128  }
  0x55   :  { %847 = vsyncadd [#allocation3], 4294967168 }
  0x56   :  { %848 = dma.done.wait [#allocation6], 256  }
  0x57   :  { %849 = vsyncadd [#allocation6], 4294967040 }
  0x58   :  { %850 = dma.done.wait [#allocation9], 512  }
  0x59   :  { %851 = vsyncadd [#allocation9], 4294966784  ;;  %v861_v0 = vmov 0.0|0.0   ;;  %vm862_vm0 = vmmov 0   ;;  %v863_v1 = vmov 0.0   ;;  %v102_v2 = vld [vmem:[%s1111_s3] sm:$0xff] }
  0x5a   :  { %655 = vmatprep.subr.bf16.mxu0 %v861_v0  ;;  %600 = vmatprep.mubr.msk.f32.mxu0 %vm862_vm0, %v863_v1  ;;  %v103_v3 = vld [vmem:[%s1111_s3 + $0x8] sm:$0xff]  ;;  %v104_v4 = vld [vmem:[%s1111_s3 + $0x10] sm:$0xff]  ;;  %v105_v6 = vld [vmem:[%s1111_s3 + $0x18] sm:$0xff]  ;;  %vm113_vm1 = vcmask 261120   ;;  %vm188_vm2 = vcmask 523264   ;;  %vm208_vm3 = vcmask 130048  }
  0x5b   :  { %661 = vmatprep.subr.bf16.mxu1 %v861_v0  ;;  %607 = vmatprep.mubr.msk.f32.mxu1 %vm862_vm0, %v863_v1  ;;  %v656_v5 = vpack.c.bf16 %v103_v3, %v102_v2  ;;  %v659_v7 = vpack.c.bf16 %v105_v6, %v104_v4  ;;  %v101_v8 = vld [vmem:[#allocation2] sm:$0xff]  ;;  %v204_v15 = vld [vmem:[#allocation5] sm:$0xff]  ;;  %v206_v16 = vld [vmem:[#allocation8] sm:$0xff] }
  0x5c   :  { %v555_v9 = vld [vmem:[%s1112_s4] ss:$0 sm:$0xff]  ;;  %702 = vtanh.f32 %v204_v15  ;;  %v197_v20 = vld [vmem:[%s1113_s5 + $0x8] sm:$0xff]  ;;  %v198_v23 = vld [vmem:[%s1113_s5 + $0x10] sm:$0xff] }
  0x5d   :  { %657 = vmatpush3.bf16.msra.mxu0 %v656_v5  ;;  %v207_v17 = vld [vmem:[#allocation8 + $0x8] sm:$0xff]  ;;  %v199_v24 = vld [vmem:[%s1113_s5 + $0x18] sm:$0xff]  ;;  %v201_v27 = vld [vmem:[%s1113_s5 + $0x28] sm:$0xff] }
  0x5e   :  { %658 = vmatprep.subr.bf16.mxu0 %v861_v0  ;;  %v662_v18 = vpack.c.bf16 %v207_v17, %v206_v16  ;;  %v196_v19 = vld [vmem:[%s1113_s5] sm:$0xff]  ;;  %v668_v25 = vpack.c.bf16 %v199_v24, %v198_v23  ;;  %v202_v29 = vld [vmem:[%s1113_s5 + $0x30] sm:$0xff]  ;;  %v203_v30 = vld [vmem:[%s1113_s5 + $0x38] sm:$0xff] }
  0x5f   :  { %v665_v22 = vpack.c.bf16 %v197_v20, %v196_v19  ;;  %v200_v26 = vld [vmem:[%s1113_s5 + $0x20] sm:$0xff]  ;;  %v674_v31 = vpack.c.bf16 %v203_v30, %v202_v29  ;;  %v355_v36 = vld [vmem:[#allocation7] sm:$0xff]  ;;  %v357_v37 = vld [vmem:[#allocation10] sm:$0xff] }
  0x60   :  { %663 = vmatpush3.bf16.msra.mxu1 %v662_v18  ;;  %v671_v28 = vpack.c.bf16 %v201_v27, %v200_v26  ;;  %v358_v38 = vld [vmem:[#allocation10 + $0x8] sm:$0xff]  ;;  %v442_v44 = vld [vmem:[%s1117_s9] sm:$0xff]  ;;  %v443_v45 = vld [vmem:[%s1117_s9 + $0x8] sm:$0xff] }
  0x61   :  { %660 = vmatpush3.bf16.msra.mxu0 %v659_v7  ;;  %664 = vmatprep.subr.bf16.mxu1 %v861_v0  ;;  %v677_v39 = vpack.c.bf16 %v358_v38, %v357_v37  ;;  %v680_v46 = vpack.c.bf16 %v443_v45, %v442_v44  ;;  %v444_v47 = vld [vmem:[%s1117_s9 + $0x10] sm:$0xff]  ;;  %v445_v48 = vld [vmem:[%s1117_s9 + $0x18] sm:$0xff]  ;;  %v446_v50 = vld [vmem:[%s1117_s9 + $0x20] sm:$0xff] }
  0x62   :  { %679 = vmatprep.subr.bf16.mxu0 %v861_v0  ;;  %v683_v49 = vpack.c.bf16 %v445_v48, %v444_v47  ;;  %v447_v51 = vld [vmem:[%s1117_s9 + $0x28] sm:$0xff]  ;;  %v448_v53 = vld [vmem:[%s1117_s9 + $0x30] sm:$0xff]  ;;  %v449_v54 = vld [vmem:[%s1117_s9 + $0x38] sm:$0xff] }
  0x63   :  { %v686_v52 = vpack.c.bf16 %v447_v51, %v446_v50  ;;  %v689_v55 = vpack.c.bf16 %v449_v54, %v448_v53  ;;  %v560_v60 = vld [vmem:[%s1116_s8] ss:$0 sm:$0xff]  ;;  %s864_s8 = smov [#allocation11]  }
  0x64   :  { %601 = vmatmul.mubr.msk.f32.vlgmr.msra.gmra.mrb[0].mxu0 %vm113_vm1, %v101_v8  ;;  %s544_s14 = sshll.u32 %s864_s8, 4  ;;  %s545_s14 = int_to_ptr.vmem [resolvable:$true] %s544_s14 }
  0x65   :  { %652 = vmatprep.mubr.msk.f32.mxu0 %vm862_vm0, %v863_v1  ;;  %681 = vmatpush3.bf16.msra.mxu0 %v680_v46  ;;  %s824_s15 = scalar_lea.vmem %s545_s14, 128  ;;  %p829_p13 = scmp.lt.s32.totalorder %s545_s14, %s545_s14 }
  0x66   :  { %v703_v21 = vpop.eup %702  ;;  %682 = vmatprep.subr.bf16.mxu0 %v861_v0  ;;  %p825_p12 = scmp.ne.s32.totalorder %s545_s14, %s824_s15  ;;  %p830_p0 = scmp.lt.s32.totalorder %s824_s15, %s824_s15 }
  0x67   :  { %608 = vmatmul.mubr.msk.f32.vlgmr.msra.gmra.mrb[0].mxu1 %vm208_vm3, %v703_v21 }
  0x68   :  { %666 = vmatpush3.bf16.msra.mxu1 %v665_v22  ;;  %626 = vmatprep.mubr.msk.f32.mxu1 %vm862_vm0, %v863_v1  ;;  %p831_p1 = por %p830_p0, %p829_p13 }
  0x69   :  { %667 = vmatprep.subr.bf16.mxu1 %v861_v0  ;;  %684 = vmatpush3.bf16.msra.mxu0 %v683_v49 }
  0x6a   :  { %685 = vmatprep.subr.bf16.mxu0 %v861_v0  ;;  %p832_p2 = pnand %p831_p1, %p825_p12 }
  0x6c   :  { %669 = vmatpush3.bf16.msra.mxu1 %v668_v25 }
  0x6d   :  { %670 = vmatprep.subr.bf16.mxu1 %v861_v0  ;;  %687 = vmatpush3.bf16.msra.mxu0 %v686_v52 }
  0x6e   :  { %688 = vmatprep.subr.bf16.mxu0 %v861_v0 }
  0x70   :  { %672 = vmatpush3.bf16.msra.mxu1 %v671_v28 }
  0x71   :  { %673 = vmatprep.subr.bf16.mxu1 %v861_v0  ;;  %690 = vmatpush3.bf16.msra.mxu0 %v689_v55 }
  0x74   :  { %675 = vmatpush3.bf16.msra.mxu1 %v674_v31 }
  0x75   :  { %676 = vmatprep.subr.bf16.mxu1 %v861_v0  ;;  %v561_v0 = vld [vmem:[%s1118_s10] ss:$0 sm:$0xff] }
 0x137   :  { %v183_v10 = vpop.f32.mrb[0].mxu0 }
 0x138   :  { %v184_v11 = vadd.f32 %v555_v9, %v183_v10  ;;  %v602_v12 = vpop.f32.mrb[1].mxu0 }
 0x13a   :  { %v187_v13 = vmul.f32 %v184_v11, %v184_v11  ;;  %v278_v42 = vpop.f32.mrb[0].mxu1 }
 0x13b   :  { %v609_v43 = vpop.f32.mrb[1].mxu1 }
 0x13c   :  { %v189_v14 = vsel %vm188_vm2, %v187_v13, 0.0 }
 0x13d   :  { %190 = vadd.xlane.f32.xlu0 %v189_v14 }
 0x1ca   :  { %v191_v32 = vpop.xlane.xlu0 %190 }
 0x1cb   :  { %v192_v33 = vmax.f32 %v191_v32, 1e-24 }
 0x1cd   :  { %704 = vrsqrt.f32 %v192_v33 }
 0x1d7   :  { %v705_v34 = vpop.eup %704 }
 0x1d8   :  { %v194_v35 = vmul.f32 %v705_v34, %v184_v11 }
 0x1da   :  { %706 = vtanh.f32 %v194_v35 }
 0x1db   :  { %708 = vtanh.f32 %v355_v36 }
 0x1e4   :  { %v707_v40 = vpop.eup %706 }
 0x1e5   :  { %627 = vmatmul.mubr.msk.f32.vlgmr.msra.gmra.mrb[2].mxu1 %vm188_vm2, %v707_v40  ;;  %v709_v41 = vpop.eup %708 }
 0x1e6   :  { %678 = vmatpush3.bf16.msra.mxu1 %v677_v39  ;;  %633 = vmatprep.mubr.msk.f32.mxu1 %vm862_vm0, %v863_v1 }
 0x1e9   :  { %634 = vmatmul.mubr.msk.f32.vlgmr.msra.gmra.mrb[4].mxu1 %vm208_vm3, %v709_v41 }
 0x2b8   :  { %v351_v56 = vpop.f32.mrb[2].mxu1 }
 0x2b9   :  { %v352_v57 = vadd.f32 %v351_v56, %v278_v42  ;;  %v628_v58 = vpop.f32.mrb[3].mxu1 }
 0x2bc   :  { %v428_v59 = vpop.f32.mrb[4].mxu1 }
 0x2bd   :  { %v432_v61 = vadd.f32 %v428_v59, %v352_v57  ;;  %v635_v62 = vpop.f32.mrb[5].mxu1 }
 0x2bf   :  { %v440_v63 = vadd.f32 %v560_v60, %v432_v61 }
 0x2c1   :  { %710 = vtanh.f32 %v440_v63 }
 0x2cb   :  { %v711_v1 = vpop.eup %710 }
 0x2cc   :  { %653 = vmatmul.mubr.msk.f32.vlgmr.msra.gmra.mrb[2].mxu0 %vm188_vm2, %v711_v1 }
 0x39f   :  { %v526_v2 = vpop.f32.mrb[2].mxu0 }
 0x3a0   :  { %v527_v3 = vadd.f32 %v561_v0, %v526_v2  ;;  %v654_v4 = vpop.f32.mrb[3].mxu0 }
 0x3a2   :  { %v530_v5 = vmul.f32 %v527_v3, %v527_v3 }
 0x3a4   :  { %v531_v6 = vsel %vm208_vm3, %v530_v5, 0.0 }
 0x3a5   :  { %532 = vadd.xlane.f32.xlu0 %v531_v6 }
 0x432   :  { %v533_v7 = vpop.xlane.xlu0 %532 }
 0x433   :  { %v534_v8 = vmax.f32 %v533_v7, 1e-24 }
 0x435   :  { %712 = vrsqrt.f32 %v534_v8 }
 0x43f   :  { %v713_v9 = vpop.eup %712 }
 0x440   :  { %v536_v10 = vmul.f32 %v713_v9, %v527_v3 }
 0x442   :  { %537 = vst.msk [vmem:[#allocation11] sm:$0xff] %vm208_vm3, %v536_v10 }
 0x443   :  { %835 = shalt.err (!%p832_p2)
}
 0x444   :  { %s836_s20 = scalar_lea.hbm %s1119_s11, 128 }
 0x445   :  { %p837_p3 = scmp.ne.s32.totalorder %s1119_s11, %s836_s20  ;;  %p840_p4 = scmp.lt.u32.totalorder %s836_s20, %s1119_s11 }
 0x447   :  { %p842_p5 = pnand %p840_p4, %p837_p3 }
 0x449   :  { %845 = shalt.err (!%p842_p5)
}
 0x44a   :  { %547 = dma.vmem_to_hbm [thread:$0]  %s545_s14, 128, %s1119_s11, [#allocation4]  }
 0x44b   :  { %852 = dma.done.wait [#allocation4], 128  }
 0x44c   :  { %853 = vsyncadd [#allocation4], 4294967168 }
 0x44d   :  { %551 = vsyncpa [#allocation3], 1 }
 0x44e   :  { %552 = vsyncpa [#allocation6], 1 }
 0x44f   :  { %553 = vsyncpa [#allocation9], 1 }
 0x450   :  { %554 = vsyncpa [#allocation4], 1 }

</bundles_post_ra>
